<compile_context>
chip_gen: v6e
topology: v6e:2x2x1
jax: 0.10.0
libtpu: 0.0.40
codegen_flags: <defaults>
</compile_context>

<pallas_src>
import functools

import numpy as np
import jax
import jax.numpy as jnp
from jax.experimental import pallas as pl
from jax.experimental.pallas import tpu as pltpu


_MAX_BLOCK_BYTES = 6 * 1024 * 1024      # per-block cap -> ~24 MiB pipelined (v7x-safe)
_TARGET_BLOCK_BYTES = 2 * 1024 * 1024   # ~HBM-roofline block size


# ---------------------------------------------------------------------------
# Fused single-pass kernel: pool + MLP + sigmoid + scale on an (Nb, C, HW) slab.
# ---------------------------------------------------------------------------
def _se_fused_kernel(x_ref, w1_ref, w2_ref, o_ref):
    # x_ref : (Nb, C, HW) native-dtype slab (HW on lanes, C on sublanes).
    # w1_ref: (C_red, C), w2_ref: (C, C_red) full FC weights (resident every step).
    x = x_ref[...]                                                   # native dtype

    # Global average pool over spatial, accumulated in f32 (no full f32 slab copy kept).
    pooled = jnp.mean(x.astype(jnp.float32), axis=-1)                # (Nb, C)

    w1 = w1_ref[...].astype(jnp.float32)                             # (C_red, C)
    w2 = w2_ref[...].astype(jnp.float32)                             # (C, C_red)

    # FC1 -> ReLU -> FC2 -> sigmoid, batched over Nb (non-degenerate MXU N dim).
    h = jax.lax.dot_general(pooled, w1, (((1,), (1,)), ((), ())),
                            preferred_element_type=jnp.float32)      # (Nb, C_red)
    h = jnp.maximum(h, 0.0)
    s = jax.lax.dot_general(h, w2, (((1,), (1,)), ((), ())),
                            preferred_element_type=jnp.float32)      # (Nb, C)
    s = jax.nn.sigmoid(s)

    # Scale: per-channel gate broadcast across all spatial lanes, native dtype multiply.
    o_ref[...] = x * s[:, :, None].astype(o_ref.dtype)


# ---------------------------------------------------------------------------
# Two-pass fallback for large slabs (VMEM budget, most relevant on v7x 64 MiB).
# ---------------------------------------------------------------------------
def _se_pool_mlp_kernel(hw, x_ref, w1_ref, w2_ref, g_ref, acc_ref):
    # Grid: (N, HW_tiles), reduction axis (tiles) last.
    # x_ref: (1, C, hw_tile); g_ref: (1, C, 1) f32 gates; acc_ref: (C, 1) f32 scratch.
    k = pl.program_id(1)

    @pl.when(k == 0)
    def _():
        acc_ref[...] = jnp.zeros_like(acc_ref)

    acc_ref[...] += jnp.sum(x_ref[0].astype(jnp.float32), axis=-1, keepdims=True)

    @pl.when(k == pl.num_programs(1) - 1)
    def _():
        pooled = acc_ref[...] * (1.0 / hw)                               # (C, 1)
        h = jnp.dot(w1_ref[...].astype(jnp.float32), pooled,
                    preferred_element_type=jnp.float32)                  # (C_red, 1)
        h = jnp.maximum(h, 0.0)
        s = jnp.dot(w2_ref[...].astype(jnp.float32), h,
                    preferred_element_type=jnp.float32)                  # (C, 1)
        g_ref[0] = jax.nn.sigmoid(s)


def _se_scale_kernel(x_ref, g_ref, o_ref):
    # x_ref: (1, C, hw_tile); g_ref: (1, C, 1) gates broadcast across lanes.
    o_ref[...] = x_ref[...] * g_ref[...].astype(o_ref.dtype)


def _pick_hw_tile(hw, c, itemsize, max_block_bytes):
    """Largest 128-multiple divisor of hw whose (C, tile) block fits the budget."""
    if hw % 128 != 0:
        return hw  # full-extent block; correct (masked stores, perf-only).
    max_lanes = max(128, ((max_block_bytes // (c * itemsize)) // 128) * 128)
    best = 128
    t = 256
    while t <= min(hw, max_lanes):
        if hw % t == 0:
            best = t
        t += 128
    return best


def _vmem_limit(block_bytes, extra_bytes):
    need = 4 * block_bytes + extra_bytes + (2 << 20)
    return int(min(max(need, 4 << 20), 56 << 20))


# ---------------------------------------------------------------------------
# Wrapper
# ---------------------------------------------------------------------------
def se_layer(x, w1, w2, *, donate_x=False,
             max_block_bytes=_MAX_BLOCK_BYTES,
             target_block_bytes=_TARGET_BLOCK_BYTES):
    """Pallas implementation of SELayer.forward.

    x  : (N, C, H, W)
    w1 : (C // reduction, C)   -- first Linear weight (bias=False)
    w2 : (C, C // reduction)   -- second Linear weight (bias=False)
    """
    N, C, H, W = x.shape
    c_red = w1.shape[0]
    assert w1.shape == (c_red, C) and w2.shape == (C, c_red)
    HW = H * W
    itemsize = jnp.dtype(x.dtype).itemsize

    x3 = x.reshape(N, C, HW)                       # free view, NCHW layout kept
    w_bytes = (w1.size * jnp.dtype(w1.dtype).itemsize
               + w2.size * jnp.dtype(w2.dtype).itemsize)
    slab_bytes = C * HW * itemsize
    io_alias = {0: 0} if donate_x else {}

    if slab_bytes <= max_block_bytes:
        # ---------------- fused single-pass ----------------
        nb = min(N,
                 max(1, target_block_bytes // slab_bytes),
                 max(1, max_block_bytes // slab_bytes))
        if N >= 2:
            nb = min(nb, max(1, N // 2))           # keep >= 2 grid steps (v7x megacore)
        nb = max(1, nb)
        while N % nb != 0:                         # grid must tile N exactly
            nb -= 1
        block_bytes = nb * slab_bytes

        cost = pl.CostEstimate(
            flops=2 * N * C * HW + 4 * N * C * c_red,
            transcendentals=N * C,
            bytes_accessed=2 * N * C * HW * itemsize + w_bytes)

        out = pl.pallas_call(
            _se_fused_kernel,
            out_shape=jax.ShapeDtypeStruct((N, C, HW), x.dtype),
            grid=(N // nb,),
            in_specs=[
                pl.BlockSpec((nb, C, HW), lambda n: (n, 0, 0)),
                pl.BlockSpec((c_red, C), lambda n: (0, 0)),
                pl.BlockSpec((C, c_red), lambda n: (0, 0)),
            ],
            out_specs=pl.BlockSpec((nb, C, HW), lambda n: (n, 0, 0)),
            compiler_params=pltpu.CompilerParams(
                dimension_semantics=("parallel",),
                vmem_limit_bytes=_vmem_limit(block_bytes, 2 * w_bytes)),
            cost_estimate=cost,
            input_output_aliases=io_alias,
        )(x3, w1, w2)
        return out.reshape(N, C, H, W)

    # ---------------- two-pass fallback (large slabs) ----------------
    hw_tile = _pick_hw_tile(HW, C, itemsize, max_block_bytes)
    num_hw_tiles = HW // hw_tile
    tile_bytes = C * hw_tile * itemsize

    # Pass 1: tiled pool (+ MLP + sigmoid on the last tile) -> gates (N, C, 1) f32.
    gates = pl.pallas_call(
        functools.partial(_se_pool_mlp_kernel, HW),
        out_shape=jax.ShapeDtypeStruct((N, C, 1), jnp.float32),
        grid=(N, num_hw_tiles),
        in_specs=[
            pl.BlockSpec((1, C, hw_tile), lambda n, k: (n, 0, k)),
            pl.BlockSpec((c_red, C), lambda n, k: (0, 0)),
            pl.BlockSpec((C, c_red), lambda n, k: (0, 0)),
        ],
        out_specs=pl.BlockSpec((1, C, 1), lambda n, k: (n, 0, 0)),
        scratch_shapes=[pltpu.VMEM((C, 1), jnp.float32)],
        compiler_params=pltpu.CompilerParams(
            dimension_semantics=("parallel", "arbitrary"),
            vmem_limit_bytes=_vmem_limit(tile_bytes, 2 * w_bytes)),
        cost_estimate=pl.CostEstimate(
            flops=N * C * HW + 4 * N * C * c_red,
            transcendentals=N * C,
            bytes_accessed=N * C * HW * itemsize + w_bytes + N * C * 4),
    )(x3, w1, w2)

    # Pass 2: lane-tiled scale.
    out = pl.pallas_call(
        _se_scale_kernel,
        out_shape=jax.ShapeDtypeStruct((N, C, HW), x.dtype),
        grid=(N, num_hw_tiles),
        in_specs=[
            pl.BlockSpec((1, C, hw_tile), lambda n, k: (n, 0, k)),
            pl.BlockSpec((1, C, 1), lambda n, k: (n, 0, 0)),
        ],
        out_specs=pl.BlockSpec((1, C, hw_tile), lambda n, k: (n, 0, k)),
        compiler_params=pltpu.CompilerParams(
            dimension_semantics=("parallel", "parallel"),
            vmem_limit_bytes=_vmem_limit(tile_bytes, N * C * 4)),
        cost_estimate=pl.CostEstimate(
            flops=N * C * HW,
            transcendentals=0,
            bytes_accessed=2 * N * C * HW * itemsize + N * C * 4),
        input_output_aliases=io_alias,
    )(x3, gates)
    return out.reshape(N, C, H, W)


def _reference_se(x, w1, w2):
    """Pure-JAX reference matching the PyTorch SELayer.forward."""
    y = jnp.mean(x, axis=(2, 3))                     # (N, C) adaptive avg pool
    y = jnp.maximum(y @ w1.T, 0.0)                   # Linear(C -> C//r), ReLU
    y = jax.nn.sigmoid(y @ w2.T)                     # Linear(C//r -> C), Sigmoid
    return x * y[:, :, None, None]


if __name__ == "__main__":
    key = jax.random.PRNGKey(0)
    k_x, k_w1, k_w2 = jax.random.split(key, 3)

    # Small shapes consistent with the module: reduction=16 needs C >= 16.
    N, C, H, W = 2, 64, 16, 16
    reduction = 16
    c_red = C // reduction

    x = jax.random.normal(k_x, (N, C, H, W), dtype=jnp.float32)
    w1 = jax.random.normal(k_w1, (c_red, C), dtype=jnp.float32) * 0.1
    w2 = jax.random.normal(k_w2, (C, c_red), dtype=jnp.float32) * 0.1

    y_ref = _reference_se(x, w1, w2)

    # Fused single-pass path (default block budget).
    y = se_layer(x, w1, w2)
    jax.block_until_ready(y)
    assert y.shape == (N, C, H, W)
    np.testing.assert_allclose(np.asarray(y), np.asarray(y_ref), rtol=1e-5, atol=1e-5)

    # Force the two-pass (tiled pool+MLP, then lane-tiled scale) large-slab fallback by
    # shrinking the block budget, so the v7x-relevant path is exercised and checked too.
    y2 = se_layer(x, w1, w2, max_block_bytes=32 * 1024)
    jax.block_until_ready(y2)
    np.testing.assert_allclose(np.asarray(y2), np.asarray(y_ref), rtol=1e-5, atol=1e-5)

    print("KERNEL_OK")
</pallas_src>

<mosaic_0001>
module attributes {stable_mosaic.version = 11 : i64} {
  func.func @_se_fused_kernel(%arg0: i32, %arg1: memref<1x64x256xf32, #tpu.memory_space<vmem>>, %arg2: memref<4x64xf32, #tpu.memory_space<vmem>>, %arg3: memref<64x4xf32, #tpu.memory_space<vmem>>, %arg4: memref<1x64x256xf32, #tpu.memory_space<vmem>>) attributes {dimension_semantics = [#tpu.dimension_semantics<parallel>], iteration_bounds = array<i64: 2>, scalar_prefetch = 0 : i64, scratch_operands = 0 : i64, tpu.core_type = #tpu.core_type<tc>, window_params = [{transform_indices = @transform_0, window_bounds = array<i64: 1, 64, 256>}, {pipeline_mode = #tpu.pipeline_mode<synchronous>, transform_indices = @transform_1, window_bounds = array<i64: 4, 64>}, {pipeline_mode = #tpu.pipeline_mode<synchronous>, transform_indices = @transform_2, window_bounds = array<i64: 64, 4>}, {transform_indices = @transform_3, window_bounds = array<i64: 1, 64, 256>}]} {
    %c0 = arith.constant 0 : index
    %c0_0 = arith.constant 0 : index
    %c0_1 = arith.constant 0 : index
    %0 = vector.load %arg1[%c0, %c0_0, %c0_1] : memref<1x64x256xf32, #tpu.memory_space<vmem>>, vector<1x64x256xf32>
    %cst = arith.constant dense<0.000000e+00> : vector<1x64xf32>
    %1 = vector.multi_reduction <add>, %0, %cst [2] : vector<1x64x256xf32> to vector<1x64xf32>
    %cst_2 = arith.constant 2.560000e+02 : f32
    %2 = vector.broadcast %cst_2 : f32 to vector<1x64xf32>
    %3 = arith.divf %1, %2 : vector<1x64xf32>
    %c0_3 = arith.constant 0 : index
    %c0_4 = arith.constant 0 : index
    %4 = vector.load %arg2[%c0_3, %c0_4] : memref<4x64xf32, #tpu.memory_space<vmem>>, vector<4x64xf32>
    %c0_5 = arith.constant 0 : index
    %c0_6 = arith.constant 0 : index
    %5 = vector.load %arg3[%c0_5, %c0_6] : memref<64x4xf32, #tpu.memory_space<vmem>>, vector<64x4xf32>
    %cst_7 = arith.constant dense<0.000000e+00> : vector<1x4xf32>
    %6 = tpu.matmul %3, %4, %cst_7 {dimension_numbers = #tpu.dot_dimension_numbers<[1], [1], [0], [0], [0, 0, 1, 0], [], []>} : vector<1x64xf32>, vector<4x64xf32>, vector<1x4xf32> -> vector<1x4xf32>
    %cst_8 = arith.constant 0.000000e+00 : f32
    %7 = vector.broadcast %cst_8 : f32 to vector<1x4xf32>
    %8 = arith.maximumf %6, %7 : vector<1x4xf32>
    %cst_9 = arith.constant dense<0.000000e+00> : vector<1x64xf32>
    %9 = tpu.matmul %8, %5, %cst_9 {dimension_numbers = #tpu.dot_dimension_numbers<[1], [1], [0], [0], [0, 0, 1, 0], [], []>} : vector<1x4xf32>, vector<64x4xf32>, vector<1x64xf32> -> vector<1x64xf32>
    %10 = arith.negf %9 : vector<1x64xf32>
    %11 = math.exp %10 : vector<1x64xf32>
    %cst_10 = arith.constant 1.000000e+00 : f32
    %12 = vector.broadcast %cst_10 : f32 to vector<1x64xf32>
    %13 = arith.addf %12, %11 : vector<1x64xf32>
    %14 = arith.divf %12, %13 : vector<1x64xf32>
    %15 = vector.shape_cast %14 : vector<1x64xf32> to vector<1x64x1xf32>
    %16 = vector.broadcast %15 : vector<1x64x1xf32> to vector<1x64x256xf32>
    %17 = arith.mulf %0, %16 : vector<1x64x256xf32>
    %c0_11 = arith.constant 0 : index
    %c0_12 = arith.constant 0 : index
    %c0_13 = arith.constant 0 : index
    %18 = vector.load %arg4[%c0_11, %c0_12, %c0_13] : memref<1x64x256xf32, #tpu.memory_space<vmem>>, vector<1x64x256xf32>
    tpu.vector_store %arg4[%c0_11, %c0_12, %c0_13], %17 {strides = array<i32>} : memref<1x64x256xf32, #tpu.memory_space<vmem>>, vector<1x64x256xf32>,
    return
  }
  func.func @transform_0(%arg0: i32) -> (i32, i32, i32) {
    %c0_i32 = arith.constant 0 : i32
    %c0_i32_0 = arith.constant 0 : i32
    %c0_i32_1 = arith.constant 0 : i32
    return %arg0, %c0_i32, %c0_i32_0 : i32, i32, i32
  }
  func.func @transform_1(%arg0: i32) -> (i32, i32) {
    %c0_i32 = arith.constant 0 : i32
    %c0_i32_0 = arith.constant 0 : i32
    %c0_i32_1 = arith.constant 0 : i32
    return %c0_i32, %c0_i32_0 : i32, i32
  }
  func.func @transform_2(%arg0: i32) -> (i32, i32) {
    %c0_i32 = arith.constant 0 : i32
    %c0_i32_0 = arith.constant 0 : i32
    %c0_i32_1 = arith.constant 0 : i32
    return %c0_i32, %c0_i32_0 : i32, i32
  }
  func.func @transform_3(%arg0: i32) -> (i32, i32, i32) {
    %c0_i32 = arith.constant 0 : i32
    %c0_i32_0 = arith.constant 0 : i32
    %c0_i32_1 = arith.constant 0 : i32
    return %arg0, %c0_i32, %c0_i32_0 : i32, i32, i32
  }
}

</mosaic_0001>

<bundles_post_ra>
// kernel: tpu_custom_call.1
= control target key start
LH: loop header
LB: loop body
LE: loop exit
PB: predicated region body
PF: predicated region fallthrough
CT: control target
= control target key end

     0   :  { %8 = vsyncpa [#allocation3], 0  ;;  %s1177_s0 = inlined_call_operand.hbm [shape: f32[2,64,256], index: 0, kind: input, shape index: {}]   ;;  %s1178_s1 = inlined_call_operand.vmem [shape: f32[4,64], index: 1, kind: input, shape index: {}]   ;;  %s1179_s2 = inlined_call_operand.vmem [shape: f32[64,4], index: 2, kind: input, shape index: {}]   ;;  %s1180_s3 = inlined_call_operand.hbm [shape: f32[2,64,256], index: 3, kind: output, shape index: {}]  }
   0x1   :  { %10 = vsyncpa [#allocation3 + $0x1], 0 }
   0x2   :  { %11 = vsyncpa [#allocation4], 0 }
   0x3   :  { %13 = vsyncpa [#allocation4 + $0x1], 0  ;;  %s886_s12 = smov 0   ;;  %s888_s13 = smov 0  }
   0x4   :  { %s890_s14 = smov 0   ;;  %s892_s15 = smov 0  }
   0x5 LB: > { %s907_s16 = sadd.s32 4294967295, %s856_s15   ;;  %s645_s17 = sadd.s32 4294967294, %s856_s15   ;;  %s856_s15 = sphi %s892_s15, %s1195_s15   ;;  %s852_s14 = sphi %s890_s14, %s1194_s14   ;;  %s848_s13 = sphi %s888_s13, %s1193_s13   ;;  %s844_s12 = sphi %s886_s12, %s1192_s12  }
   0x6   : > { %s911_s18 = sadd.s32 1, %s856_s15   ;;  %s26_s19 = sadd.s32 1, %s852_s14 }
   0x7   : > { %s23_s20 = ssub.s32 %s856_s15, %s911_s18  ;;  %p33_p0 = scmp.ne.s32.totalorder %s852_s14, %s848_s13 }
   0x8   : > { %p24_p1 = scmp.eq.s32.totalorder %s23_s20, 0  ;;  %p34_p2 = scmp.eq.s32.totalorder %s856_s15, 0 }
   0x9   : > { %p39_p3 = scmp.ne.s32.totalorder %s848_s13, %s844_s12  ;;  %p40_p4 = scmp.eq.s32.totalorder %s907_s16, 0 }
   0xa   : > { %s923_s21 = scalar_select %p24_p1, %s852_s14, %s26_s19  }
   0xb   : > { %p925_p5 = por %p34_p2, %p33_p0  ;;  %p929_p6 = por %p40_p4, %p39_p3 }
   0xc   : > { %p105_p7 = scmp.eq.s32.totalorder %s907_s16, 1  ;;  %p111_p8 = scmp.eq.s32.totalorder %s645_s17, 1 }
   0xd   : > { %s1184_s23 = scalar_select %p929_p6, 1, 0 }
   0xe   : > { %p720_p10 = scmp.lt.s32.totalorder %s856_s15, 2  ;;  %p936_p11 = por %p105_p7, %p33_p0 }
   0xf   : > { %p940_p12 = por %p111_p8, %p39_p3  ;;  %s137_s26 = sand.u32 1, %s852_s14  }
  0x10   : > { %s1185_s24 = scalar_select %p936_p11, 1, 0 }
  0x11   : > { %s1186_s25 = scalar_select %p940_p12, 1, 0 }
  0x12   : > { %s671_s27 = sshll.u32 %s856_s15, 11  ;;  %s648_s28 = sshll.u32 %s137_s26, 7 }
  0x13   : > { %s949_s4 = scalar_lea.hbm %s1177_s0, %s671_s27  ;;  %s141_s5 = scalar_lea.vmem [#allocation2], %s648_s28 }
  0x14   : > { %s148_s6 = sshll.u32 %s141_s5, 4  ;;  %p953_p13 = pnand %p720_p10, %p925_p5  ;;  %s957_s6 = int_to_ptr.vmem [resolvable:$true] %s148_s6 }
  0x15   : > { %s959_s8 = scalar_lea.sflag [#allocation3], %s137_s26  ;;  %s764_s9 = scalar_lea.hbm %s949_s4, 2048 }
  0x16   : > { %p765_p0 = scmp.ne.s32.totalorder %s949_s4, %s764_s9  ;;  %p766_p1 = pneg %p953_p13 }
  0x17   : > { %s769_s17 = scalar_lea.hbm %s1177_s0, 4096  ;;  %p770_p4 = scmp.lt.s32.totalorder %s949_s4, %s1177_s0 }
  0x18   : > { %p767_p2 = pnand %p766_p1, %p765_p0  ;;  %p771_p5 = scmp.lt.s32.totalorder %s769_s17, %s764_s9 }
  0x1a   : > { %p768_p3 = pneg %p767_p2  ;;  %p772_p7 = por %p771_p5, %p770_p4 }
  0x1c   : > { %p773_p8 = pnand %p772_p7, %p768_p3 }
  0x1e   : > { %776 = shalt.err (!%p773_p8)
}
  0x1f   : > { %s777_s22 = scalar_lea.vmem %s957_s6, 2048  ;;  %s858_s26 = smov [#allocation2]  }
  0x20   : > { %p778_p10 = scmp.ne.s32.totalorder %s957_s6, %s777_s22  ;;  %s782_s27 = sshll.u32 %s858_s26, 4  ;;  %s783_s27 = int_to_ptr.vmem [resolvable:$false] %s782_s27 }
  0x21   : > { %s784_s28 = scalar_lea.vmem %s783_s27, 4096  ;;  %p785_p2 = scmp.lt.s32.totalorder %s957_s6, %s783_s27 }
  0x22   : > { %p780_p9 = pnand %p778_p10, %p766_p1  ;;  %p786_p12 = scmp.lt.s32.totalorder %s784_s28, %s777_s22 }
  0x24   : > { %p781_p0 = pneg %p780_p9  ;;  %p787_p11 = por %p786_p12, %p785_p2 }
  0x26   : > { %p788_p6 = pnand %p787_p11, %p781_p0 }
  0x28   : > { %791 = shalt.err (!%p788_p6)
}
  0x29   : > { %s859_s29 = smov 256   ;;  %s860_s30 = smov 16  }
  0x2a   : > { %715 = dma.hbm_to_vmem [thread:$0]  (!%p953_p13), %s949_s4, 2048, %s957_s6, %s959_s8, %s859_s29, %s859_s29, %s860_s30  }
  0x2b   : > { %p651_p9 = scmp.ge.s32.totalorder %s856_s15, 1  ;;  %p156_p1 = scmp.lt.s32.totalorder %s856_s15, 3 }
  0x2d   : > { %p157_p3 = pnand %p651_p9, %p156_p1 }
  0x2e   : > { %s983_s5 = sand.u32 (!%p157_p3), 1, %s848_s13   ;;  %p1188_p6 = scmp.ne.s32.totalorder (!%p157_p3), %s1184_s23, 0 }
  0x2f   : > { %160 = sbr.rel (%p157_p3) target bundleno = 781 (0x30d), region = 32  ;;  %s652_s9 = sshll.u32 (!%p157_p3), %s983_s5, 7 }
  0x30   : > { %s163_s10 = scalar_lea.sflag (!%p157_p3), [#allocation3], %s983_s5  ;;  %s166_s11 = scalar_lea.vmem (!%p157_p3), [#allocation2], %s652_s9 }
  0x34   : > { %835 = dma.done.wait (%p1188_p6), %s163_s10, 2048  }
  0x35   : > { %837 = vsyncadd (%p1188_p6), %s163_s10, 4294965248  ;;  %v993_v0 = vld [vmem:[%s166_s11] sm:$0xff]  ;;  %v995_v1 = vld [vmem:[%s166_s11 + $0x8] sm:$0xff]  ;;  %v861_v24 = vmov 0.0   ;;  %vm310_vm0 = vcmask 523264   ;;  %vm862_vm1 = vmmov 0   ;;  %v255_v33 = vlaneseq }
  0x36   : > { %v997_v2 = vld [vmem:[%s166_s11 + $0x20] sm:$0xff]  ;;  %v205_v3 = vadd.f32 %v995_v1, %v993_v0  ;;  %v1001_v4 = vld [vmem:[%s166_s11 + $0x28] sm:$0xff]  ;;  %v1003_v5 = vld [vmem:[%s166_s11 + $0x10] sm:$0xff]  ;;  %684 = vmatprep.subr.mxu0 %v861_v24  ;;  %689 = vmatprep.subr.mxu1 %v861_v24  ;;  %vm387_vm2 = vcmask 31744   ;;  %vm266_vm3 = vcmask 130112   ;;  %vm273_vm4 = vcmask 195712  }
  0x37   : > { %v1005_v6 = vld [vmem:[%s166_s11 + $0x18] sm:$0xff]  ;;  %v211_v7 = vadd.f32 %v1001_v4, %v997_v2  ;;  %v1009_v8 = vld [vmem:[%s166_s11 + $0x30] sm:$0xff]  ;;  %v1017_v12 = vld [vmem:[%s166_s11 + $0x40] sm:$0xff]  ;;  %686 = vmatprep.mubr.msk.f32.mxu0 %vm862_vm1, %v861_v24  ;;  %705 = vmatprep.mubr.msk.f32.mxu1 %vm862_vm1, %v861_v24  ;;  %v256_v34 = vand.u32 127, %v255_v33  ;;  %v1073_v35 = vshrl.u32 %v255_v33, 7  ;;  %vm280_vm5 = vcmask 261312  }
  0x38   : > { %v1011_v9 = vld [vmem:[%s166_s11 + $0x38] sm:$0xff]  ;;  %206 = vadd.xlane.f32.xlu0 %v205_v3  ;;  %v208_v10 = vadd.f32 %v1005_v6, %v1003_v5  ;;  %v1019_v13 = vld [vmem:[%s166_s11 + $0x48] sm:$0xff]  ;;  %v1021_v14 = vld [vmem:[%s166_s11 + $0x50] sm:$0xff]  ;;  %vm287_vm6 = vcmask 326912   ;;  %vm294_vm7 = vcmask 392512   ;;  %vm301_vm8 = vcmask 458112  }
  0x39   : > { %212 = vadd.xlane.f32.xlu1 %v211_v7  ;;  %v214_v11 = vadd.f32 %v1011_v9, %v1009_v8  ;;  %v1023_v15 = vld [vmem:[%s166_s11 + $0x58] sm:$0xff]  ;;  %v217_v16 = vadd.f32 %v1019_v13, %v1017_v12  ;;  %v1029_v18 = vld [vmem:[%s166_s11 + $0x60] sm:$0xff]  ;;  %v1031_v19 = vld [vmem:[%s166_s11 + $0x68] sm:$0xff]  ;;  %v261_v36 = vadd.s32 4294967288, %v256_v34  ;;  %v268_v38 = vadd.s32 4294967280, %v256_v34  ;;  %s1097_s6 = scalar_lea.vmem [#allocation5], %s652_s9 }
  0x3a   : > { %v220_v17 = vadd.f32 %v1023_v15, %v1021_v14  ;;  %v1033_v20 = vld [vmem:[%s166_s11 + $0x70] sm:$0xff]  ;;  %v1035_v21 = vld [vmem:[%s166_s11 + $0x78] sm:$0xff]  ;;  %v223_v22 = vadd.f32 %v1031_v19, %v1029_v18  ;;  %v238_v25 = vld [vmem:[%s1178_s1] sm:$0xf]  ;;  %v275_v39 = vadd.s32 4294967272, %v256_v34  ;;  %v259_v41 = vsub.s32 %v256_v34, %v1073_v35  ;;  %s672_s9 = sshll.u32 %s907_s16, 11 }
  0x3b   : > { %v226_v23 = vadd.f32 %v1035_v21, %v1033_v20  ;;  %685 = vmatpush3.xpose.msk.msra.mxu0 %vm310_vm0, %v238_v25  ;;  %v246_v26 = vld [vmem:[%s1179_s2 + $0x38] sm:$0xff]  ;;  %v245_v27 = vld [vmem:[%s1179_s2 + $0x30] sm:$0xff]  ;;  %v244_v28 = vld [vmem:[%s1179_s2 + $0x28] sm:$0xff]  ;;  %v264_v43 = vsub.s32 %v261_v36, %v1073_v35  ;;  %v282_v44 = vadd.s32 4294967264, %v256_v34  ;;  %v271_v45 = vsub.s32 %v268_v38, %v1073_v35  ;;  %s572_s7 = sshll.u32 %s1097_s6, 4  ;;  %s1128_s19 = scalar_lea.hbm %s1180_s3, %s672_s9  ;;  %s1130_s7 = int_to_ptr.vmem [resolvable:$true] %s572_s7 }
  0x3c   : > { %209 = vadd.xlane.f32.xlu0 %v208_v10  ;;  %690 = vmatpush3.xpose.msk.msra.mxu1 %vm387_vm2, %v246_v26  ;;  %v243_v29 = vld [vmem:[%s1179_s2 + $0x20] sm:$0xff]  ;;  %v242_v30 = vld [vmem:[%s1179_s2 + $0x18] sm:$0xff]  ;;  %v241_v31 = vld [vmem:[%s1179_s2 + $0x10] sm:$0xff]  ;;  %v278_v48 = vsub.s32 %v275_v39, %v1073_v35  ;;  %v289_v49 = vadd.s32 4294967256, %v256_v34  ;;  %v296_v56 = vadd.s32 4294967248, %v256_v34  ;;  %v303_v61 = vadd.s32 4294967240, %v256_v34 }
  0x3d   : > { %215 = vadd.xlane.f32.xlu1 %v214_v11  ;;  %691 = vmatprep.subr.mxu1 %v861_v24  ;;  %v240_v32 = vld [vmem:[%s1179_s2 + $0x8] sm:$0xff]  ;;  %v285_v55 = vsub.s32 %v282_v44, %v1073_v35  ;;  %vm308_vm9 = vcmask 523712   ;;  %v239_v34 = vld [vmem:[%s1179_s2] sm:$0xff]  ;;  %v493_v44 = vsub.s32 0, %v1073_v35  ;;  %s559_s16 = scalar_lea.sflag [#allocation4], %s983_s5  ;;  %s792_s20 = scalar_lea.vmem %s1130_s7, 2048 }
  0x3e   : > { %v292_v60 = vsub.s32 %v289_v49, %v1073_v35  ;;  %p793_p11 = scmp.ne.s32.totalorder %s1130_s7, %s792_s20  ;;  %p1189_p12 = scmp.ne.s32.totalorder %s1185_s24, 0 }
  0x3f   : > { %s863_s22 = smov [#allocation5]  }
  0x40   : > { %218 = vadd.xlane.f32.xlu0 %v217_v16  ;;  %692 = vmatpush3.xpose.msk.msra.mxu1 %vm387_vm2, %v245_v27  ;;  %p794_p13 = pnand %p793_p11, %p1189_p12  ;;  %s796_s26 = sshll.u32 %s863_s22, 4  ;;  %s797_s26 = int_to_ptr.vmem [resolvable:$false] %s796_s26 }
  0x41   : > { %221 = vadd.xlane.f32.xlu1 %v220_v17  ;;  %693 = vmatprep.subr.mxu1 %v861_v24  ;;  %v299_v17 = vsub.s32 %v296_v56, %v1073_v35  ;;  %s798_s27 = scalar_lea.vmem %s797_s26, 4096  ;;  %p799_p5 = scmp.lt.s32.totalorder %s1130_s7, %s797_s26 }
  0x42   : > { %p795_p4 = pneg %p794_p13  ;;  %p800_p7 = scmp.lt.s32.totalorder %s798_s27, %s792_s20 }
  0x44   : > { %224 = vadd.xlane.f32.xlu0 %v223_v22  ;;  %694 = vmatpush3.xpose.msk.msra.mxu1 %vm387_vm2, %v244_v28  ;;  %p801_p8 = por %p800_p7, %p799_p5 }
  0x45   : > { %227 = vadd.xlane.f32.xlu1 %v226_v23  ;;  %695 = vmatprep.subr.mxu1 %v861_v24 }
  0x46   : > { %p802_p10 = pnand %p801_p8, %p795_p4 }
  0x48   : > { %696 = vmatpush3.xpose.msk.msra.mxu1 %vm387_vm2, %v243_v29 }
  0x49   : > { %697 = vmatprep.subr.mxu1 %v861_v24 }
  0x4c   : > { %698 = vmatpush3.xpose.msk.msra.mxu1 %vm387_vm2, %v242_v30 }
  0x4d   : > { %699 = vmatprep.subr.mxu1 %v861_v24 }
  0x50   : > { %700 = vmatpush3.xpose.msk.msra.mxu1 %vm387_vm2, %v241_v31 }
  0x51   : > { %701 = vmatprep.subr.mxu1 %v861_v24 }
  0x54   : > { %702 = vmatpush3.xpose.msk.msra.mxu1 %vm387_vm2, %v240_v32 }
  0x55   : > { %703 = vmatprep.subr.mxu1 %v861_v24  ;;  %v306_v24 = vsub.s32 %v303_v61, %v1073_v35 }
  0x58   : > { %704 = vmatpush3.xpose.msk.msra.mxu1 %vm387_vm2, %v239_v34 }
  0xc1   : > { %v207_v37 = vpop.xlane.xlu0 %206 }
  0xc2   : > { %v213_v40 = vpop.xlane.xlu1 %212  ;;  %v230_v42 = vmul.f32 0.00390625, %v207_v37 }
  0xc3   : > { %v232_v46 = vmul.f32 0.00390625, %v213_v40 }
  0xc4   : > { %v260_v53 = vrot.slane %v230_v42, %v259_v41 }
  0xc5   : > { %v210_v47 = vpop.xlane.xlu0 %209  ;;  %v272_v57 = vrot.slane %v232_v46, %v271_v45 }
  0xc6   : > { %v231_v50 = vmul.f32 0.00390625, %v210_v47  ;;  %v216_v51 = vpop.xlane.xlu1 %215 }
  0xc7   : > { %v233_v52 = vmul.f32 0.00390625, %v216_v51 }
  0xc8   : > { %v265_v54 = vrot.slane %v231_v50, %v264_v43 }
  0xc9   : > { %v279_v58 = vrot.slane %v233_v52, %v278_v48  ;;  %v219_v59 = vpop.xlane.xlu0 %218 }
  0xca   : > { %v267_v62 = vsel %vm266_vm3, %v265_v54, %v260_v53  ;;  %v234_v63 = vmul.f32 0.00390625, %v219_v59  ;;  %v222_v3 = vpop.xlane.xlu1 %221 }
  0xcb   : > { %v274_v7 = vsel %vm273_vm4, %v272_v57, %v267_v62  ;;  %v235_v10 = vmul.f32 0.00390625, %v222_v3 }
  0xcc   : > { %v281_v11 = vsel %vm280_vm5, %v279_v58, %v274_v7  ;;  %v286_v16 = vrot.slane %v234_v63, %v285_v55 }
  0xcd   : > { %v293_v22 = vrot.slane %v235_v10, %v292_v60  ;;  %v225_v23 = vpop.xlane.xlu0 %224 }
  0xce   : > { %v288_v25 = vsel %vm287_vm6, %v286_v16, %v281_v11  ;;  %v236_v26 = vmul.f32 0.00390625, %v225_v23  ;;  %v228_v27 = vpop.xlane.xlu1 %227 }
  0xcf   : > { %v237_v28 = vmul.f32 0.00390625, %v228_v27  ;;  %v295_v30 = vsel %vm294_vm7, %v293_v22, %v288_v25 }
  0xd0   : > { %v300_v29 = vrot.slane %v236_v26, %v299_v17 }
  0xd1   : > { %v307_v31 = vrot.slane %v237_v28, %v306_v24 }
  0xd2   : > { %v302_v32 = vsel %vm301_vm8, %v300_v29, %v295_v30 }
  0xd3   : > { %v309_v33 = vsel %vm308_vm9, %v307_v31, %v302_v32 }
  0xd4   : > { %687 = vmatmul.mubr.msk.f32.vlgmr.msra.gmra.mxu0 %vm310_vm0, %v309_v33 }
 0x194   : > { %v382_v36 = vpop.f32.mrf.mxu0 }
 0x195   : > { %v386_v37 = vmax.f32 %v382_v36, 0.0 }
 0x196   : > { %v688_v38 = vpop.f32.mrf.mxu0 }
 0x197   : > { %706 = vmatmul.mubr.msk.f32.vlgmr.msra.gmra.mxu1 %vm387_vm2, %v386_v37 }
 0x257   : > { %v481_v39 = vpop.f32.mrf.mxu1 }
 0x258   : > { %v665_v40 = vmul.f32 -1.442695, %v481_v39 }
 0x259   : > { %v707_v41 = vpop.f32.mrf.mxu1 }
 0x25a   : > { %760 = vpow2.f32 %v665_v40 }
 0x267   : > { %v761_v42 = vpop.eup %760 }
 0x268   : > { %v488_v43 = vadd.f32 1.0, %v761_v42 }
 0x26a   : > { %762 = vrcp.f32 %v488_v43 }
 0x277   : > { %v763_v45 = vpop.eup %762 }
 0x278   : > { %v494_v46 = vrot.slane %v763_v45, %v493_v44 }
 0x27a   : > { %500 = vbcast.lane.b32.xlu1 %v494_v46, 264  ;;  %496 = vbcast.lane.b32.xlu0 %v494_v46, 256 }
 0x27e   : > { %504 = vbcast.lane.b32.xlu1 %v494_v46, 272  ;;  %512 = vbcast.lane.b32.xlu0 %v494_v46, 288 }
 0x282   : > { %508 = vbcast.lane.b32.xlu1 %v494_v46, 280  ;;  %520 = vbcast.lane.b32.xlu0 %v494_v46, 304 }
 0x286   : > { %516 = vbcast.lane.b32.xlu1 %v494_v46, 296 }
 0x28a   : > { %524 = vbcast.lane.b32.xlu1 %v494_v46, 312 }
 0x2ec   : > { %v501_v47 = vpop.permute.xlu1 %500  ;;  %v497_v48 = vpop.permute.xlu0 %496 }
 0x2ed   : > { %v528_v49 = vmul.f32 %v501_v47, %v1003_v5  ;;  %v529_v50 = vmul.f32 %v501_v47, %v1005_v6  ;;  %v526_v51 = vmul.f32 %v497_v48, %v993_v0  ;;  %v527_v35 = vmul.f32 %v497_v48, %v995_v1 }
 0x2ef   : > { %544 = vst [vmem:[%s1097_s6 + $0x10] sm:$0xff] %v528_v49  ;;  %545 = vst [vmem:[%s1097_s6 + $0x18] sm:$0xff] %v529_v50 }
 0x2f0   : > { %542 = vst [vmem:[%s1097_s6] sm:$0xff] %v526_v51  ;;  %543 = vst [vmem:[%s1097_s6 + $0x8] sm:$0xff] %v527_v35  ;;  %v505_v5 = vpop.permute.xlu1 %504  ;;  %v513_v0 = vpop.permute.xlu0 %512 }
 0x2f1   : > { %v530_v1 = vmul.f32 %v505_v5, %v997_v2  ;;  %v531_v6 = vmul.f32 %v505_v5, %v1001_v4  ;;  %v534_v52 = vmul.f32 %v513_v0, %v1017_v12  ;;  %v535_v53 = vmul.f32 %v513_v0, %v1019_v13 }
 0x2f3   : > { %546 = vst [vmem:[%s1097_s6 + $0x20] sm:$0xff] %v530_v1  ;;  %547 = vst [vmem:[%s1097_s6 + $0x28] sm:$0xff] %v531_v6 }
 0x2f4   : > { %550 = vst [vmem:[%s1097_s6 + $0x40] sm:$0xff] %v534_v52  ;;  %551 = vst [vmem:[%s1097_s6 + $0x48] sm:$0xff] %v535_v53  ;;  %v509_v54 = vpop.permute.xlu1 %508  ;;  %v521_v55 = vpop.permute.xlu0 %520 }
 0x2f5   : > { %v532_v2 = vmul.f32 %v509_v54, %v1009_v8  ;;  %v533_v56 = vmul.f32 %v509_v54, %v1011_v9  ;;  %v538_v4 = vmul.f32 %v521_v55, %v1029_v18  ;;  %v539_v12 = vmul.f32 %v521_v55, %v1031_v19 }
 0x2f7   : > { %548 = vst [vmem:[%s1097_s6 + $0x30] sm:$0xff] %v532_v2  ;;  %549 = vst [vmem:[%s1097_s6 + $0x38] sm:$0xff] %v533_v56 }
 0x2f8   : > { %554 = vst [vmem:[%s1097_s6 + $0x60] sm:$0xff] %v538_v4  ;;  %555 = vst [vmem:[%s1097_s6 + $0x68] sm:$0xff] %v539_v12  ;;  %v517_v13 = vpop.permute.xlu1 %516 }
 0x2f9   : > { %v536_v57 = vmul.f32 %v517_v13, %v1021_v14  ;;  %v537_v58 = vmul.f32 %v517_v13, %v1023_v15 }
 0x2fb   : > { %552 = vst [vmem:[%s1097_s6 + $0x50] sm:$0xff] %v536_v57  ;;  %553 = vst [vmem:[%s1097_s6 + $0x58] sm:$0xff] %v537_v58 }
 0x2fc   : > { %v525_v8 = vpop.permute.xlu1 %524 }
 0x2fd   : > { %v540_v9 = vmul.f32 %v525_v8, %v1033_v20  ;;  %v541_v14 = vmul.f32 %v525_v8, %v1035_v21 }
 0x2ff   : > { %556 = vst [vmem:[%s1097_s6 + $0x70] sm:$0xff] %v540_v9  ;;  %557 = vst [vmem:[%s1097_s6 + $0x78] sm:$0xff] %v541_v14 }
 0x300   : > { %805 = shalt.err (!%p802_p10)
}
 0x301   : > { %s806_s28 = scalar_lea.hbm %s1128_s19, 2048  ;;  %s810_s10 = scalar_lea.hbm %s1180_s3, 4096 }
 0x302   : > { %p807_p0 = scmp.ne.s32.totalorder %s1128_s19, %s806_s28  ;;  %p811_p1 = scmp.lt.s32.totalorder %s1128_s19, %s1180_s3 }
 0x303   : > { %p812_p3 = scmp.lt.s32.totalorder %s810_s10, %s806_s28 }
 0x304   : > { %p808_p2 = pnand %p807_p0, %p1189_p12 }
 0x305   : > { %p813_p6 = por %p812_p3, %p811_p1 }
 0x306   : > { %p809_p9 = pneg %p808_p2 }
 0x308   : > { %p814_p11 = pnand %p813_p6, %p809_p9 }
 0x30a   : > { %817 = shalt.err (!%p814_p11)
}
 0x30b   : > { %s864_s4 = smov 256   ;;  %s865_s6 = smov 16  }
 0x30c   : > { %710 = dma.vmem_to_hbm [thread:$0]  (%p1189_p12), %s1130_s7, 2048, %s1128_s19, %s559_s16, %s864_s4, %s864_s4, %s865_s6  }
 0x30d PF: > { %s587_s9 = sand.u32 1, %s844_s12   ;;  %p1190_p13 = scmp.ne.s32.totalorder %s1186_s25, 0 }
 0x30e   : > { %p1191_p4 = scmp.ge.s32.totalorder %s856_s15, 2  ;;  %s588_s8 = scalar_lea.sflag [#allocation4], %s587_s9 }
 0x310   : > { %p717_p5 = pnand %p1191_p4, %p1190_p13 }
 0x312   : > { %p718_p7 = pneg %p717_p5 }
 0x314   : > { %839 = dma.done.wait (%p718_p7), %s588_s8, 2048  }
 0x315   : > { %841 = vsyncadd (%p718_p7), %s588_s8, 4294965248  ;;  %p16_p8 = scmp.ge.s32.totalorder %s911_s18, 4   ;;  %s1192_s12 = smov %s848_s13 }
 0x316   : > { %s1193_s13 = smov %s852_s14  ;;  %s1194_s14 = smov %s923_s21 }
 0x317   : > { %s1195_s15 = smov %s911_s18  ;;  %18 = sbr.rel (!%p16_p8) target bundleno = 5 (0x5), region = 77 }
 0x31c   :  { %593 = vsyncpa [#allocation3], 1 }
 0x31d   :  { %595 = vsyncpa [#allocation3 + $0x1], 1 }
 0x31e   :  { %596 = vsyncpa [#allocation4], 1 }
 0x31f   :  { %598 = vsyncpa [#allocation4 + $0x1], 1 }

</bundles_post_ra>
